<compile_context>
chip_gen: v7x
topology: tpu7x:2x2x1
jax: 0.10.0
libtpu: 0.0.40
codegen_flags: <defaults>
</compile_context>

<pallas_src>
import functools

import jax
import jax.numpy as jnp
from jax import lax
from jax.experimental import pallas as pl
from jax.experimental.pallas import tpu as pltpu


# ----------------------------------------------------------------------------
# Kernel 1: fused encode() = masked-mean pooling -> pooler Linear -> L2 normalize
#   Tiled over (batch, seq); seq is the reduction axis (last, "arbitrary").
# ----------------------------------------------------------------------------
def _encode_kernel(hidden_ref, mask_ref, w_ref, b_ref, out_ref, acc_ref, cnt_ref):
    s = pl.program_id(1)

    @pl.when(s == 0)
    def _init():
        acc_ref[...] = jnp.zeros_like(acc_ref)
        cnt_ref[...] = jnp.zeros_like(cnt_ref)

    # Masked partial sums for this (batch-tile, seq-tile) block.  The multiply
    # stays in the input dtype (bf16 on v6e/v7x halves VPU work and vreg
    # pressure; mask is {0,1} so the result is exact); accumulation is f32.
    # TODO(synk): on v5e (no bf16 VALU) an f32 upcast before the multiply is
    #             marginally better; kept generic here.
    h = hidden_ref[...]                                    # (TB, TS, H)
    m = mask_ref[...]                                      # (TB, TS)
    hm = h * m.astype(h.dtype)[:, :, None]                 # masked_fill + mul
    acc_ref[...] += jnp.sum(hm, axis=1, dtype=jnp.float32)
    cnt_ref[...] += jnp.sum(m.astype(jnp.float32), axis=1, keepdims=True)

    # Epilogue once per batch tile: mean -> pooler Linear (MXU) -> L2 normalize.
    @pl.when(s == pl.num_programs(1) - 1)
    def _finalize():
        # mean pooling: reciprocal runs on the EUP slot, then a VPU multiply.
        inv_cnt = pl.reciprocal(jnp.maximum(cnt_ref[...], 1e-9), approx=False)
        pooled = acc_ref[...] * inv_cnt                    # (TB, H)
        # pooler weight kept in its torch (E, H) layout; contract on H (MXU
        # handles the transposed RHS natively, no HBM transpose copy).
        proj = lax.dot_general(pooled, w_ref[...].astype(jnp.float32),
                               (((1,), (1,)), ((), ())),
                               preferred_element_type=jnp.float32)
        proj = proj + b_ref[...].astype(jnp.float32)
        sumsq = jnp.sum(proj * proj, axis=-1, keepdims=True)
        # F.normalize(p=2, dim=1); rsqrt runs on the EUP (its own VLIW slot).
        out_ref[...] = proj * lax.rsqrt(jnp.maximum(sumsq, 1e-24))


def _largest_aligned_divisor(n, cap, align):
    """Largest d <= cap with n % d == 0 and (d == n or d % align == 0); 0 if none."""
    cap = min(cap, n)
    for d in range(cap, 0, -1):
        if n % d == 0 and (d == n or d % align == 0):
            return d
    return 0


def encode(hidden, mask, w, b_row, *, tb_cap=256):
    """Masked-mean pool + pooler Linear + L2 normalize for a (Bt, S, H) batch.

    hidden: (Bt, S, H) f32/bf16; mask: (Bt, S); w: (E, H) torch Linear layout;
    b_row: (1, E).  Returns (Bt, E) float32.
    """
    Bt, S, H = hidden.shape
    E = w.shape[0]
    h_itemsize = jnp.dtype(hidden.dtype).itemsize
    m_itemsize = jnp.dtype(mask.dtype).itemsize

    # --- per-chip VMEM budget (v7x: 64 MiB, v5e/v6e: 128 MiB) ----------------
    try:
        vmem_cap = int(pltpu.get_tpu_info().vmem_capacity_bytes)
    except Exception:  # pragma: no cover - fall back to the smallest (v7x)
        vmem_cap = 64 * 1024 * 1024
    hidden_budget = (vmem_cap * 3) // 8        # double-buffered hidden block budget

    # --- sequence tile: a divisor of S (NO jnp.pad of the big hidden tensor) --
    ts_cap = max(8, hidden_budget // (2 * 8 * H * h_itemsize))
    if S <= ts_cap:
        ts = S                                 # full-seq block: always layout-legal
    else:
        # mask block (tb, ts) puts ts on the lane axis -> multiple of 128 unless == S.
        ts = _largest_aligned_divisor(S, ts_cap, 128)
        if ts == 0:
            ts = S                             # fallback: full S (rare, e.g. odd S)

    # --- batch tile: a divisor of Bt (mask sublane axis -> %8 or == Bt) -------
    tb_cap = min(tb_cap, max(8, hidden_budget // (2 * ts * H * h_itemsize)))
    tb = _largest_aligned_divisor(Bt, tb_cap, 8)
    pad_b = 0
    if tb == 0:
        if 2 * Bt * ts * H * h_itemsize <= vmem_cap // 2:
            tb = Bt                            # whole batch as one tile still fits
        else:
            # Last resort only (no legal divisor and Bt too large for one tile):
            # pad the batch; padded rows carry mask=0 and are sliced off below.
            pad_b = (-Bt) % 8
            hidden = jnp.pad(hidden, ((0, pad_b), (0, 0), (0, 0)))
            mask = jnp.pad(mask, ((0, pad_b), (0, 0)))
            tb = _largest_aligned_divisor(Bt + pad_b, tb_cap, 8)
    Bp = Bt + pad_b
    grid = (Bp // tb, S // ts if S % ts == 0 else 1)

    # VMEM estimate (conservative: pooler weight/bias counted double-buffered).
    est = (2 * tb * ts * H * h_itemsize                  # hidden double buffer
           + 2 * tb * ts * m_itemsize                    # mask double buffer
           + 2 * (E * H * 4 + E * 4)                     # resident weight / bias
           + 2 * tb * max(E, 128) * 4                    # output double buffer
           + tb * max(H, 128) * 4 + tb * 128 * 4)        # scratch accumulators
    # v7x (64 MiB): cap ~40 MiB; v5e/v6e (128 MiB): cap ~96 MiB.
    limit_cap = max(16 * 2 ** 20, min(vmem_cap - 24 * 2 ** 20, (vmem_cap * 3) // 4))
    vmem_limit = int(min(limit_cap, max(16 * 2 ** 20, 2 * est)))

    out = pl.pallas_call(
        _encode_kernel,
        out_shape=jax.ShapeDtypeStruct((Bp, E), jnp.float32),
        grid=grid,
        in_specs=[
            pl.BlockSpec((tb, ts, H), lambda b, s: (b, s, 0)),
            pl.BlockSpec((tb, ts), lambda b, s: (b, s)),
            pl.BlockSpec((E, H), lambda b, s: (0, 0)),   # stays resident across grid
            pl.BlockSpec((1, E), lambda b, s: (0, 0)),
        ],
        out_specs=pl.BlockSpec((tb, E), lambda b, s: (b, 0)),
        scratch_shapes=[
            pltpu.VMEM((tb, H), jnp.float32),   # running masked sum
            pltpu.VMEM((tb, 1), jnp.float32),   # running token count
        ],
        compiler_params=pltpu.CompilerParams(
            dimension_semantics=("parallel", "arbitrary"),
            vmem_limit_bytes=vmem_limit),
    )(hidden, mask, w, b_row)
    return out[:Bt] if pad_b else out


# ----------------------------------------------------------------------------
# Kernel 2: contrastive scores + cross-entropy + KD (KL) loss
#   Single lane-contiguous scores output; positive logit via row-wise dot.
# ----------------------------------------------------------------------------
def _loss_kernel(q_ref, p_ref, nflat_ref, ngrp_ref, teacher_ref,
                 scores_ref, loss_ref, *, temperature, loss_scale, kd_weight):
    q = q_ref[...]            # (B, E)
    p = p_ref[...]            # (B, E)
    nflat = nflat_ref[...]    # (B*NNEG, E)
    ngrp = ngrp_ref[...]      # (B, NNEG, E)

    B = q.shape[0]
    BN = nflat.shape[0]
    ND = B + BN
    inv_t = jnp.float32(1.0 / temperature)
    dn = (((1,), (1,)), ((), ()))  # contract last dims (A @ B^T) on the MXU

    # --- full contrastive score blocks (already divided by temperature) ---
    # d_all = cat([p, n]) is never materialized: qk is built as [q@p^T, q@n^T].
    qp = lax.dot_general(q, p, dn, preferred_element_type=jnp.float32) * inv_t       # (B, B)
    qn = lax.dot_general(q, nflat, dn, preferred_element_type=jnp.float32) * inv_t   # (B, BN)
    kq = lax.dot_general(p, q, dn, preferred_element_type=jnp.float32) * inv_t       # (B, B)
    qq = lax.dot_general(q, q, dn, preferred_element_type=jnp.float32) * inv_t       # (B, B)
    kk = lax.dot_general(p, p, dn, preferred_element_type=jnp.float32) * inv_t       # (B, B)

    # labels = arange(B) and d_all[:B] == p, so the positive logit is just q.p.
    label_score = jnp.sum(q * p, axis=-1, keepdims=True) * inv_t                     # (B, 1)

    diag = (lax.broadcasted_iota(jnp.int32, (B, B), 0)
            == lax.broadcasted_iota(jnp.int32, (B, B), 1))
    ninf = jnp.float32(-jnp.inf)
    kq = jnp.where(diag, ninf, kq)
    qq = jnp.where(diag, ninf, qq)
    kk = jnp.where(diag, ninf, kk)

    # One lane-contiguous scores output: cat([q@d^T, p@q^T, q@q^T, p@p^T], -1),
    # written block-by-block at its column offset (no post-hoc HBM concat).
    scores_ref[:, 0:B] = qp
    scores_ref[:, B:ND] = qn
    scores_ref[:, ND:ND + B] = kq
    scores_ref[:, ND + B:ND + 2 * B] = qq
    scores_ref[:, ND + 2 * B:ND + 3 * B] = kk

    # --- cross entropy over the concatenated row, labels[b] = b ---
    rm = jnp.max(qp, -1, keepdims=True)
    rm = jnp.maximum(rm, jnp.max(qn, -1, keepdims=True))
    rm = jnp.maximum(rm, jnp.max(kq, -1, keepdims=True))
    rm = jnp.maximum(rm, jnp.max(qq, -1, keepdims=True))
    rm = jnp.maximum(rm, jnp.max(kk, -1, keepdims=True))
    se = (jnp.sum(jnp.exp(qp - rm), -1, keepdims=True)
          + jnp.sum(jnp.exp(qn - rm), -1, keepdims=True)
          + jnp.sum(jnp.exp(kq - rm), -1, keepdims=True)
          + jnp.sum(jnp.exp(qq - rm), -1, keepdims=True)
          + jnp.sum(jnp.exp(kk - rm), -1, keepdims=True))
    lse = jnp.log(se) + rm                                          # (B, 1)
    ce = jnp.sum(lse - label_score, keepdims=True) / B              # (1, 1), mean CE

    # --- KD: student scores q . [p_b ; n_b*] vs teacher, KLDivLoss(batchmean) ---
    sp = label_score                                 # reuse q.p/T, no recompute
    sn = jnp.sum(q[:, None, :] * ngrp, -1) * inv_t                  # (B, NNEG)
    sm = jnp.maximum(sp, jnp.max(sn, -1, keepdims=True))
    s_lse = jnp.log(jnp.exp(sp - sm)
                    + jnp.sum(jnp.exp(sn - sm), -1, keepdims=True)) + sm
    lp_p = sp - s_lse                                               # log_softmax, pos col
    lp_n = sn - s_lse                                               # log_softmax, neg cols

    # NaN-safe KL: target * (log_softmax(teacher) - log_softmax(student)).
    t = teacher_ref[...]                                            # (B, 1+NNEG)
    t_max = jnp.max(t, -1, keepdims=True)
    t_lse = jnp.log(jnp.sum(jnp.exp(t - t_max), -1, keepdims=True)) + t_max
    log_tgt = t - t_lse
    tgt = jnp.exp(log_tgt)
    kl = (jnp.sum(tgt[:, 0:1] * (log_tgt[:, 0:1] - lp_p), keepdims=True)
          + jnp.sum(tgt[:, 1:] * (log_tgt[:, 1:] - lp_n), keepdims=True)) / B  # (1, 1)

    # loss = kl + 0.2 * (cross_entropy * loss_scale)
    loss_ref[...] = kl + jnp.float32(kd_weight) * (ce * jnp.float32(loss_scale))


def contrastive_kd_loss(q, p, n, teacher, *, temperature=1.0,
                        loss_scale=1.0, kd_weight=0.2):
    """q, p: (B, E); n: (B*NNEG, E) grouped as [b0 negs, b1 negs, ...]."""
    B, E = q.shape
    BN = n.shape[0]
    NNEG = BN // B
    ND = B + BN
    ngrp = n.reshape(B, NNEG, E)                 # free leading-dim reshape (XLA view)

    kernel = functools.partial(_loss_kernel, temperature=temperature,
                               loss_scale=loss_scale, kd_weight=kd_weight)
    # TODO(synk): if device-gathered negatives make ND large (v7x 64 MiB VMEM),
    #             add a grid axis over ND with online logsumexp instead of one block.
    scores, loss = pl.pallas_call(
        kernel,
        out_shape=(
            jax.ShapeDtypeStruct((B, ND + 3 * B), jnp.float32),
            jax.ShapeDtypeStruct((1, 1), jnp.float32),
        ),
        grid=(1,),
        in_specs=[
            pl.BlockSpec((B, E), lambda i: (0, 0)),
            pl.BlockSpec((B, E), lambda i: (0, 0)),
            pl.BlockSpec((BN, E), lambda i: (0, 0)),
            pl.BlockSpec((B, NNEG, E), lambda i: (0, 0, 0)),
            pl.BlockSpec((B, 1 + NNEG), lambda i: (0, 0)),
        ],
        out_specs=(
            pl.BlockSpec((B, ND + 3 * B), lambda i: (0, 0)),
            pl.BlockSpec((1, 1), lambda i: (0, 0)),
        ),
        compiler_params=pltpu.CompilerParams(dimension_semantics=("arbitrary",)),
    )(q, p, n, ngrp, teacher)
    return scores, loss[0, 0]


# ----------------------------------------------------------------------------
# Forward wrapper mirroring AutoModelForEmbeddingMNKD.forward
# ----------------------------------------------------------------------------
def mnkd_forward(params, query, pos, negs, teacher_score,
                 temperature=1.0, loss_scale=1.0):
    w = params["pooler_w"]                     # (E, H) torch Linear layout, no .T copy
    b_row = params["pooler_b"].reshape(1, -1)  # (1, E)

    # Encode each segment separately: no HBM concat/pad of the dominant
    # (B, S, H) tensors (encode is HBM-bandwidth-bound; the pooler weight DMA
    # repeated per call is trivial by comparison).
    q_emb = encode(query["last_hidden_state"], query["attention_mask"], w, b_row)
    p_emb = encode(pos["last_hidden_state"], pos["attention_mask"], w, b_row)
    n_emb = encode(negs["last_hidden_state"], negs["attention_mask"], w, b_row)

    scores, loss = contrastive_kd_loss(
        q_emb, p_emb, n_emb, teacher_score,
        temperature=temperature, loss_scale=loss_scale, kd_weight=0.2)

    # Only the tiny (B*(1+NNEG), E) embeddings are concatenated.
    d_emb = jnp.concatenate([p_emb, n_emb], axis=0)
    return {"q_reps": q_emb, "d_reps": d_emb, "scores": scores, "loss": loss}


# ----------------------------------------------------------------------------
# Plain-JAX reference (same math) for verification
# ----------------------------------------------------------------------------
def reference_forward(params, query, pos, negs, teacher, temperature, loss_scale):
    w, b = params["pooler_w"], params["pooler_b"]

    def enc(h, m):
        s = jnp.sum(h * m[:, :, None], axis=1)
        d = jnp.maximum(jnp.sum(m, axis=1, keepdims=True), 1e-9)
        proj = (s / d) @ w.T + b
        nrm = jnp.sqrt(jnp.sum(proj * proj, axis=-1, keepdims=True))
        return proj / jnp.maximum(nrm, 1e-12)

    q = enc(query["last_hidden_state"], query["attention_mask"])
    p = enc(pos["last_hidden_state"], pos["attention_mask"])
    n = enc(negs["last_hidden_state"], negs["attention_mask"])
    B, E = q.shape
    d_all = jnp.concatenate([p, n], axis=0)

    def offdiag(x):
        return jnp.where(jnp.eye(x.shape[0], dtype=bool), -jnp.inf, x)

    qk = (q @ d_all.T) / temperature
    kq = offdiag(p @ q.T) / temperature
    qq = offdiag(q @ q.T) / temperature
    kk = offdiag(p @ p.T) / temperature
    scores = jnp.concatenate([qk, kq, qq, kk], axis=-1)
    lse = jax.scipy.special.logsumexp(scores, axis=-1)
    ce = jnp.mean(lse - qk[jnp.arange(B), jnp.arange(B)])

    d_stack = jnp.concatenate([p[:, None, :], n.reshape(B, -1, E)], axis=1)
    student = jnp.einsum("be,bje->bj", q, d_stack) / temperature
    logp = jax.nn.log_softmax(student, axis=-1)
    logt = jax.nn.log_softmax(teacher, axis=-1)
    tgt = jnp.exp(logt)
    kl = jnp.sum(tgt * (logt - logp)) / B
    loss = kl + 0.2 * (ce * loss_scale)
    return {"q_reps": q, "d_reps": d_all, "scores": scores, "loss": loss}


def _lenmask(lengths, S):
    B = lengths.shape[0]
    return (lax.broadcasted_iota(jnp.int32, (B, S), 1)
            < lengths[:, None]).astype(jnp.float32)


if __name__ == "__main__":
    B, S, H, E, NNEG = 2, 8, 32, 32, 3
    temperature, loss_scale = 0.05, 1.0

    key = jax.random.PRNGKey(0)
    ks = jax.random.split(key, 6)
    query = {
        "last_hidden_state": jax.random.normal(ks[0], (B, S, H), jnp.float32),
        "attention_mask": _lenmask(jnp.array([6, 8]), S),
    }
    pos = {
        "last_hidden_state": jax.random.normal(ks[1], (B, S, H), jnp.float32),
        "attention_mask": _lenmask(jnp.array([8, 5]), S),
    }
    negs = {
        "last_hidden_state": jax.random.normal(ks[2], (B * NNEG, S, H), jnp.float32),
        "attention_mask": _lenmask(jnp.array([7, 8, 6, 8, 5, 8]), S),
    }
    teacher_score = jax.random.normal(ks[3], (B, 1 + NNEG), jnp.float32)

    # pooler = nn.Linear(H, E): weight (E, H), bias (E,)
    params = {
        "pooler_w": 0.1 * jax.random.normal(ks[4], (E, H), jnp.float32),
        "pooler_b": 0.01 * jax.random.normal(ks[5], (E,), jnp.float32),
    }

    out = mnkd_forward(params, query, pos, negs, teacher_score,
                       temperature=temperature, loss_scale=loss_scale)
    jax.block_until_ready(out)

    ref = reference_forward(params, query, pos, negs, teacher_score,
                            temperature, loss_scale)

    def finite(x):
        return jnp.where(jnp.isinf(x), jnp.float32(-1e30), x)

    assert jnp.allclose(out["q_reps"], ref["q_reps"], rtol=1e-4, atol=1e-4)
    assert jnp.allclose(out["d_reps"], ref["d_reps"], rtol=1e-4, atol=1e-4)
    assert jnp.allclose(finite(out["scores"]), finite(ref["scores"]),
                        rtol=1e-3, atol=1e-3)
    assert abs(float(out["loss"]) - float(ref["loss"])) < 1e-3

    print("KERNEL_OK")
</pallas_src>

<mosaic_0001>
module attributes {stable_mosaic.version = 11 : i64} {
  func.func @_encode_kernel(%arg0: i32, %arg1: i32, %arg2: memref<2x8x32xf32, #tpu.memory_space<vmem>>, %arg3: memref<2x8xf32, #tpu.memory_space<vmem>>, %arg4: memref<32x32xf32, #tpu.memory_space<vmem>>, %arg5: memref<1x32xf32, #tpu.memory_space<vmem>>, %arg6: memref<2x32xf32, #tpu.memory_space<vmem>>, %arg7: memref<2x32xf32, #tpu.memory_space<vmem>>, %arg8: memref<2x1xf32, #tpu.memory_space<vmem>>) attributes {dimension_semantics = [#tpu.dimension_semantics<parallel>, #tpu.dimension_semantics<arbitrary>], iteration_bounds = array<i64: 1, 1>, scalar_prefetch = 0 : i64, scratch_operands = 2 : i64, tpu.core_type = #tpu.core_type<tc>, window_params = [{transform_indices = @transform_0, window_bounds = array<i64: 2, 8, 32>}, {transform_indices = @transform_1, window_bounds = array<i64: 2, 8>}, {pipeline_mode = #tpu.pipeline_mode<synchronous>, transform_indices = @transform_2, window_bounds = array<i64: 32, 32>}, {pipeline_mode = #tpu.pipeline_mode<synchronous>, transform_indices = @transform_3, window_bounds = array<i64: 1, 32>}, {transform_indices = @transform_4, window_bounds = array<i64: 2, 32>}]} {
    %c0_i32 = arith.constant 0 : i32
    %0 = arith.cmpi eq, %arg1, %c0_i32 : i32
    %1 = arith.extui %0 : i1 to i32
    %c0_i32_0 = arith.constant 0 : i32
    %2 = arith.cmpi ne, %1, %c0_i32_0 : i32
    scf.if %2 {
      %cst_16 = arith.constant 0.000000e+00 : f32
      %20 = vector.broadcast %cst_16 : f32 to vector<2x32xf32>
      %c0_17 = arith.constant 0 : index
      %c0_18 = arith.constant 0 : index
      %21 = vector.load %arg7[%c0_17, %c0_18] : memref<2x32xf32, #tpu.memory_space<vmem>>, vector<2x32xf32>
      tpu.vector_store %arg7[%c0_17, %c0_18], %20 {strides = array<i32>} : memref<2x32xf32, #tpu.memory_space<vmem>>, vector<2x32xf32>,
      %cst_19 = arith.constant 0.000000e+00 : f32
      %22 = vector.broadcast %cst_19 : f32 to vector<2x1xf32>
      %c0_20 = arith.constant 0 : index
      %c0_21 = arith.constant 0 : index
      %23 = vector.load %arg8[%c0_20, %c0_21] : memref<2x1xf32, #tpu.memory_space<vmem>>, vector<2x1xf32>
      tpu.vector_store %arg8[%c0_20, %c0_21], %22 {strides = array<i32>} : memref<2x1xf32, #tpu.memory_space<vmem>>, vector<2x1xf32>,
    } else {
    }
    %c0 = arith.constant 0 : index
    %c0_1 = arith.constant 0 : index
    %c0_2 = arith.constant 0 : index
    %3 = vector.load %arg2[%c0, %c0_1, %c0_2] : memref<2x8x32xf32, #tpu.memory_space<vmem>>, vector<2x8x32xf32>
    %c0_3 = arith.constant 0 : index
    %c0_4 = arith.constant 0 : index
    %4 = vector.load %arg3[%c0_3, %c0_4] : memref<2x8xf32, #tpu.memory_space<vmem>>, vector<2x8xf32>
    %5 = vector.shape_cast %4 : vector<2x8xf32> to vector<2x8x1xf32>
    %6 = vector.broadcast %5 : vector<2x8x1xf32> to vector<2x8x32xf32>
    %7 = arith.mulf %3, %6 : vector<2x8x32xf32>
    %c0_5 = arith.constant 0 : index
    %c0_6 = arith.constant 0 : index
    %8 = vector.load %arg7[%c0_5, %c0_6] : memref<2x32xf32, #tpu.memory_space<vmem>>, vector<2x32xf32>
    %cst = arith.constant dense<0.000000e+00> : vector<2x32xf32>
    %9 = vector.multi_reduction <add>, %7, %cst [1] : vector<2x8x32xf32> to vector<2x32xf32>
    %10 = arith.addf %8, %9 : vector<2x32xf32>
    %c0_7 = arith.constant 0 : index
    %c0_8 = arith.constant 0 : index
    %11 = vector.load %arg7[%c0_7, %c0_8] : memref<2x32xf32, #tpu.memory_space<vmem>>, vector<2x32xf32>
    tpu.vector_store %arg7[%c0_7, %c0_8], %10 {strides = array<i32>} : memref<2x32xf32, #tpu.memory_space<vmem>>, vector<2x32xf32>,
    %c0_9 = arith.constant 0 : index
    %c0_10 = arith.constant 0 : index
    %12 = vector.load %arg8[%c0_9, %c0_10] : memref<2x1xf32, #tpu.memory_space<vmem>>, vector<2x1xf32>
    %cst_11 = arith.constant dense<0.000000e+00> : vector<2xf32>
    %13 = vector.multi_reduction <add>, %4, %cst_11 [1] : vector<2x8xf32> to vector<2xf32>
    %14 = vector.shape_cast %13 : vector<2xf32> to vector<2x1xf32>
    %15 = arith.addf %12, %14 : vector<2x1xf32>
    %c0_12 = arith.constant 0 : index
    %c0_13 = arith.constant 0 : index
    %16 = vector.load %arg8[%c0_12, %c0_13] : memref<2x1xf32, #tpu.memory_space<vmem>>, vector<2x1xf32>
    tpu.vector_store %arg8[%c0_12, %c0_13], %15 {strides = array<i32>} : memref<2x1xf32, #tpu.memory_space<vmem>>, vector<2x1xf32>,
    %c0_i32_14 = arith.constant 0 : i32
    %17 = arith.cmpi eq, %arg1, %c0_i32_14 : i32
    %18 = arith.extui %17 : i1 to i32
    %c0_i32_15 = arith.constant 0 : i32
    %19 = arith.cmpi ne, %18, %c0_i32_15 : i32
    scf.if %19 {
      %c0_16 = arith.constant 0 : index
      %c0_17 = arith.constant 0 : index
      %20 = vector.load %arg8[%c0_16, %c0_17] : memref<2x1xf32, #tpu.memory_space<vmem>>, vector<2x1xf32>
      %cst_18 = arith.constant 9.99999971E-10 : f32
      %21 = vector.broadcast %cst_18 : f32 to vector<2x1xf32>
      %22 = arith.maximumf %20, %21 : vector<2x1xf32>
      %23 = tpu.reciprocal %22 : vector<2x1xf32> -> vector<2x1xf32>
      %c0_19 = arith.constant 0 : index
      %c0_20 = arith.constant 0 : index
      %24 = vector.load %arg7[%c0_19, %c0_20] : memref<2x32xf32, #tpu.memory_space<vmem>>, vector<2x32xf32>
      %25 = vector.broadcast %23 : vector<2x1xf32> to vector<2x32xf32>
      %26 = arith.mulf %24, %25 : vector<2x32xf32>
      %c0_21 = arith.constant 0 : index
      %c0_22 = arith.constant 0 : index
      %27 = vector.load %arg4[%c0_21, %c0_22] : memref<32x32xf32, #tpu.memory_space<vmem>>, vector<32x32xf32>
      %cst_23 = arith.constant dense<0.000000e+00> : vector<2x32xf32>
      %28 = tpu.matmul %26, %27, %cst_23 {dimension_numbers = #tpu.dot_dimension_numbers<[1], [1], [0], [0], [0, 0, 1, 0], [], []>} : vector<2x32xf32>, vector<32x32xf32>, vector<2x32xf32> -> vector<2x32xf32>
      %c0_24 = arith.constant 0 : index
      %c0_25 = arith.constant 0 : index
      %29 = vector.load %arg5[%c0_24, %c0_25] : memref<1x32xf32, #tpu.memory_space<vmem>>, vector<1x32xf32>
      %30 = vector.broadcast %29 : vector<1x32xf32> to vector<2x32xf32>
      %31 = arith.addf %28, %30 : vector<2x32xf32>
      %32 = arith.mulf %31, %31 : vector<2x32xf32>
      %cst_26 = arith.constant dense<0.000000e+00> : vector<2xf32>
      %33 = vector.multi_reduction <add>, %32, %cst_26 [1] : vector<2x32xf32> to vector<2xf32>
      %34 = vector.shape_cast %33 : vector<2xf32> to vector<2x1xf32>
      %cst_27 = arith.constant 1.000000e-24 : f32
      %35 = vector.broadcast %cst_27 : f32 to vector<2x1xf32>
      %36 = arith.maximumf %34, %35 : vector<2x1xf32>
      %37 = math.rsqrt %36 : vector<2x1xf32>
      %38 = vector.broadcast %37 : vector<2x1xf32> to vector<2x32xf32>
      %39 = arith.mulf %31, %38 : vector<2x32xf32>
      %c0_28 = arith.constant 0 : index
      %c0_29 = arith.constant 0 : index
      %40 = vector.load %arg6[%c0_28, %c0_29] : memref<2x32xf32, #tpu.memory_space<vmem>>, vector<2x32xf32>
      tpu.vector_store %arg6[%c0_28, %c0_29], %39 {strides = array<i32>} : memref<2x32xf32, #tpu.memory_space<vmem>>, vector<2x32xf32>,
    } else {
    }
    return
  }
  func.func @transform_0(%arg0: i32, %arg1: i32) -> (i32, i32, i32) {
    %c0_i32 = arith.constant 0 : i32
    %c0_i32_0 = arith.constant 0 : i32
    return %arg0, %arg1, %c0_i32 : i32, i32, i32
  }
  func.func @transform_1(%arg0: i32, %arg1: i32) -> (i32, i32) {
    %c0_i32 = arith.constant 0 : i32
    return %arg0, %arg1 : i32, i32
  }
  func.func @transform_2(%arg0: i32, %arg1: i32) -> (i32, i32) {
    %c0_i32 = arith.constant 0 : i32
    %c0_i32_0 = arith.constant 0 : i32
    %c0_i32_1 = arith.constant 0 : i32
    return %c0_i32, %c0_i32_0 : i32, i32
  }
  func.func @transform_3(%arg0: i32, %arg1: i32) -> (i32, i32) {
    %c0_i32 = arith.constant 0 : i32
    %c0_i32_0 = arith.constant 0 : i32
    %c0_i32_1 = arith.constant 0 : i32
    return %c0_i32, %c0_i32_0 : i32, i32
  }
  func.func @transform_4(%arg0: i32, %arg1: i32) -> (i32, i32) {
    %c0_i32 = arith.constant 0 : i32
    %c0_i32_0 = arith.constant 0 : i32
    return %arg0, %c0_i32 : i32, i32
  }
}

</mosaic_0001>

<bundles_post_ra>
// kernel: tpu_custom_call.1
= control target key start
LH: loop header
LB: loop body
LE: loop exit
PB: predicated region body
PF: predicated region fallthrough
CT: control target
= control target key end

     0   :  { %9 = vsyncpa [#allocation5], 0  ;;  %s445_s0 = inlined_call_operand.hbm [shape: f32[2,8,32], index: 0, kind: input, shape index: {}]   ;;  %s446_s1 = inlined_call_operand.vmem [shape: f32[2,8], index: 1, kind: input, shape index: {}]   ;;  %s447_s2 = inlined_call_operand.hbm [shape: f32[32,32], index: 2, kind: input, shape index: {}]   ;;  %s448_s3 = inlined_call_operand.vmem [shape: f32[1,32], index: 3, kind: input, shape index: {}]   ;;  %s449_s4 = inlined_call_operand.hbm [shape: f32[2,32], index: 4, kind: output, shape index: {}]  }
   0x1   :  { %10 = vsyncpa [#allocation8], 0 }
   0x2   :  { %11 = vsyncpa [#allocation6], 0  ;;  %s355_s15 = smov [#allocation4]   ;;  %s283_s19 = scalar_lea.hbm %s445_s0, 256 }
   0x3   :  { %s17_s16 = sshll.u32 %s355_s15, 4  ;;  %p284_p0 = scmp.ne.s32.totalorder %s445_s0, %s283_s19  ;;  %s18_s16 = int_to_ptr.vmem [resolvable:$true] %s17_s16 }
   0x4   :  { %p287_p1 = scmp.lt.u32.totalorder %s283_s19, %s445_s0 }
   0x6   :  { %p289_p2 = pnand %p287_p1, %p284_p0 }
   0x8   :  { %292 = shalt.err (!%p289_p2)
}
   0x9   :  { %s293_s24 = scalar_lea.vmem %s18_s16, 256  ;;  %p298_p4 = scmp.lt.s32.totalorder %s18_s16, %s18_s16 }
   0xa   :  { %p294_p3 = scmp.ne.s32.totalorder %s18_s16, %s293_s24  ;;  %p299_p5 = scmp.lt.s32.totalorder %s293_s24, %s293_s24 }
   0xc   :  { %p300_p6 = por %p299_p5, %p298_p4 }
   0xe   :  { %p301_p7 = pnand %p300_p6, %p294_p3 }
  0x10   :  { %304 = shalt.err (!%p301_p7)
}
  0x11   :  { %s356_s25 = smov 128   ;;  %s357_s26 = smov 8  }
  0x12   :  { %23 = dma.hbm_to_vmem [thread:$0]  %s445_s0, 256, %s18_s16, [#allocation5], %s356_s25, %s356_s25, %s357_s26  }
  0x13   :  { %s358_s29 = smov [#allocation7]   ;;  %s305_s7 = scalar_lea.hbm %s447_s2, 512 }
  0x14   :  { %s31_s30 = sshll.u32 %s358_s29, 4  ;;  %p306_p8 = scmp.ne.s32.totalorder %s447_s2, %s305_s7  ;;  %s32_s30 = int_to_ptr.vmem [resolvable:$true] %s31_s30 }
  0x15   :  { %p309_p9 = scmp.lt.u32.totalorder %s305_s7, %s447_s2 }
  0x17   :  { %p311_p10 = pnand %p309_p9, %p306_p8 }
  0x19   :  { %314 = shalt.err (!%p311_p10)
}
  0x1a   :  { %s315_s12 = scalar_lea.vmem %s32_s30, 512  ;;  %p320_p12 = scmp.lt.s32.totalorder %s32_s30, %s32_s30 }
  0x1b   :  { %p316_p11 = scmp.ne.s32.totalorder %s32_s30, %s315_s12  ;;  %p321_p13 = scmp.lt.s32.totalorder %s315_s12, %s315_s12 }
  0x1d   :  { %p322_p0 = por %p321_p13, %p320_p12 }
  0x1f   :  { %p323_p1 = pnand %p322_p0, %p316_p11 }
  0x21   :  { %326 = shalt.err (!%p323_p1)
}
  0x22   :  { %37 = dma.hbm_to_vmem [thread:$0]  %s447_s2, 512, %s32_s30, [#allocation8], %s356_s25, %s356_s25, %s357_s26  }
  0x23   :  { %349 = dma.done.wait [#allocation5], 256  }
  0x24   :  { %350 = vsyncadd [#allocation5], 4294967040 }
  0x25   :  { %351 = dma.done.wait [#allocation8], 512  }
  0x26   :  { %352 = vsyncadd [#allocation8], 4294966784  ;;  %vm50_vm0 = vcmask 254976   ;;  %vm52_vm1 = vcmask 1024   ;;  %v359_v0 = vmov 0.0   ;;  %vm98_vm2 = vcmask 58368  }
  0x27   :  { %51 = vst.msk [vmem:[#allocation2] sm:$0x3] %vm50_vm0, %v359_v0  ;;  %v56_v1 = vld [vmem:[%s446_s1] sm:$0x3]  ;;  %v57_v3 = vlaneseq  ;;  %v360_v8 = vmov 0   ;;  %vm74_vm3 = vcmask 261120  }
  0x28   :  { %53 = vst.msk [vmem:[#allocation3] sm:$0x3] %vm52_vm1, %v359_v0  ;;  %v99_v2 = vsel %vm98_vm2, %v56_v1, 0.0  ;;  %277 = vset.pattern.permute.xlu1 %v360_v8  ;;  %278 = vset.pattern.permute.xlu0 %v360_v8  ;;  %v118_v10 = vld [vmem:[#allocation7] sm:$0xff]  ;;  %v119_v11 = vld [vmem:[#allocation7 + $0x8] sm:$0xff]  ;;  %vm262_vm4 = vmpackc.low %vm74_vm3, %vm74_vm3  ;;  %v361_v12 = vmov 0.0|0.0  }
  0x29   :  { %100 = vadd.xlane.f32.xlu0 %v99_v2  ;;  %v58_v4 = vshrl.u32 %v57_v3, 7  ;;  %260 = vmatprep.subr.bf16.mxu0 %v361_v12  ;;  %v261_v13 = vpack.c.bf16 %v119_v11, %v118_v10  ;;  %v120_v14 = vld [vmem:[#allocation7 + $0x10] sm:$0xff]  ;;  %v121_v15 = vld [vmem:[#allocation7 + $0x18] sm:$0xff]  ;;  %vm91_vm5 = vcmask 1041409   ;;  %vm362_vm6 = vmmov 0   ;;  %s363_s16 = smov [#allocation9]  }
  0x2a   :  { %v265_v16 = vpack.c.bf16 %v121_v15, %v120_v14  ;;  %v55_v17 = vld [vmem:[#allocation4 + $0x8] sm:$0xff]  ;;  %v54_v26 = vld [vmem:[#allocation4] sm:$0xff]  ;;  %257 = vmatprep.mubr.msk.f32.mxu0 %vm362_vm6, %v359_v0  ;;  %v238_v49 = vld [vmem:[%s448_s3] ss:$0 sm:$0xff]  ;;  %s228_s17 = sshll.u32 %s363_s16, 4  ;;  %s229_s17 = int_to_ptr.vmem [resolvable:$true] %s228_s17 }
  0x2b   :  { %v66_v5 = vsub.s32 1, %v58_v4  ;;  %v59_v6 = vsub.s32 0, %v58_v4  ;;  %263 = vmatpush3.bf16.xpose.msk.msra.mxu0 %vm262_vm4, %v261_v13  ;;  %s327_s18 = scalar_lea.vmem %s229_s17, 32  ;;  %p332_p3 = scmp.lt.s32.totalorder %s229_s17, %s229_s17 }
  0x2c   :  { %264 = vmatprep.subr.bf16.mxu0 %v361_v12  ;;  %p328_p2 = scmp.ne.s32.totalorder %s229_s17, %s327_s18  ;;  %p333_p4 = scmp.lt.s32.totalorder %s327_s18, %s327_s18 }
  0x2d   :  { %v67_v7 = vrot.slane %v56_v1, %v66_v5  ;;  %v60_v9 = vrot.slane %v56_v1, %v59_v6 }
  0x2e   :  { %v73_v41 = vld [vmem:[#allocation2] sm:$0x3]  ;;  %p334_p5 = por %p333_p4, %p332_p3 }
  0x2f   :  { %69 = vbcast.lane.b32.xlu1 %v67_v7, 256  ;;  %v97_v22 = vld [vmem:[#allocation3] sm:$0x3] }
  0x30   :  { %p335_p6 = pnand %p334_p5, %p328_p2 }
  0x33   :  { %267 = vmatpush3.bf16.xpose.msk.msra.mxu0 %vm262_vm4, %v265_v16 }
  0x3f   :  { %62 = vbcast.lane.b32.xlu0 %v60_v9, 256 }
  0xa1   :  { %v70_v18 = vpop.permute.xlu1 %69 }
  0xa2   :  { %v72_v19 = vmul.f32 %v70_v18, %v55_v17 }
  0xa4   :  { %v82_v20 = vsel %vm74_vm3, %v72_v19, 0.0 }
  0xa5   :  { %v83_v21 = vrot.slane %v82_v20, 4 }
  0xa7   :  { %v84_v24 = vadd.f32 %v83_v21, %v82_v20 }
  0xa9   :  { %v85_v27 = vrot.slane %v84_v24, 2 }
  0xab   :  { %v86_v31 = vadd.f32 %v85_v27, %v84_v24 }
  0xad   :  { %v87_v36 = vrot.slane %v86_v31, 1 }
  0xaf   :  { %v88_v39 = vadd.f32 %v87_v36, %v86_v31 }
  0xb6   :  { %v101_v23 = vpop.xlane.xlu0 %100 }
  0xb7   :  { %v102_v25 = vadd.f32 %v101_v23, %v97_v22 }
  0xb9   :  { %104 = vst.msk [vmem:[#allocation3] sm:$0x3] %vm52_vm1, %v102_v25 }
  0xba   :  { %v63_v28 = vpop.permute.xlu0 %62 }
  0xbb   :  { %v71_v29 = vmul.f32 %v63_v28, %v54_v26 }
  0xbd   :  { %v75_v30 = vsel %vm74_vm3, %v71_v29, 0.0 }
  0xbe   :  { %v76_v32 = vrot.slane %v75_v30, 4 }
  0xc0   :  { %v108_v33 = vld [vmem:[#allocation3] sm:$0x3]  ;;  %v77_v34 = vadd.f32 %v76_v32, %v75_v30 }
  0xc1   :  { %v109_v35 = vmax.f32 %v108_v33, 1e-09 }
  0xc2   :  { %v78_v37 = vrot.slane %v77_v34, 2 }
  0xc3   :  { %279 = vrcp.f32 %v109_v35 }
  0xc4   :  { %v79_v38 = vadd.f32 %v78_v37, %v77_v34 }
  0xc6   :  { %v80_v40 = vrot.slane %v79_v38, 1 }
  0xc8   :  { %v81_v42 = vadd.f32 %v80_v40, %v79_v38 }
  0xca   :  { %v92_v43 = vsel %vm91_vm5, %v88_v39, %v81_v42 }
  0xcb   :  { %v94_v44 = vadd.f32 %v92_v43, %v73_v41 }
  0xcd   :  { %v280_v45 = vpop.eup %279  ;;  %96 = vst.msk [vmem:[#allocation2] sm:$0x3] %vm50_vm0, %v94_v44 }
  0xce   :  { %114 = vperm.xlu1 %277, %v280_v45  }
  0xd4   :  { %v111_v47 = vld [vmem:[#allocation2] sm:$0x3] }
 0x14d   :  { %v115_v46 = vpop.permute.xlu1 %114 }
 0x14e   :  { %v117_v48 = vmul.f32 %v115_v46, %v111_v47 }
 0x150   :  { %258 = vmatmul.mubr.msk.f32.vlgmr.msra.gmra.mrb[0].mxu0 %vm74_vm3, %v117_v48 }
 0x223   :  { %v210_v50 = vpop.f32.mrb[0].mxu0 }
 0x224   :  { %v211_v51 = vadd.f32 %v238_v49, %v210_v50  ;;  %v259_v52 = vpop.f32.mrb[1].mxu0 }
 0x226   :  { %v214_v53 = vmul.f32 %v211_v51, %v211_v51 }
 0x228   :  { %v215_v54 = vsel %vm50_vm0, %v214_v53, 0.0 }
 0x229   :  { %216 = vadd.xlane.f32.xlu1 %v215_v54 }
 0x2b6   :  { %v217_v55 = vpop.xlane.xlu1 %216 }
 0x2b7   :  { %v218_v56 = vmax.f32 %v217_v55, 1e-24 }
 0x2b9   :  { %281 = vrsqrt.f32 %v218_v56 }
 0x2c3   :  { %v282_v57 = vpop.eup %281 }
 0x2c4   :  { %v220_v58 = vmul.f32 %v282_v57, %v211_v51 }
 0x2c6   :  { %221 = vst.msk [vmem:[#allocation9] sm:$0x3] %vm50_vm0, %v220_v58 }
 0x2c7   :  { %338 = shalt.err (!%p335_p6)
}
 0x2c8   :  { %s339_s20 = scalar_lea.hbm %s449_s4, 32 }
 0x2c9   :  { %p340_p7 = scmp.ne.s32.totalorder %s449_s4, %s339_s20  ;;  %p343_p8 = scmp.lt.u32.totalorder %s339_s20, %s449_s4 }
 0x2cb   :  { %p345_p9 = pnand %p343_p8, %p340_p7 }
 0x2cd   :  { %348 = shalt.err (!%p345_p9)
}
 0x2ce   :  { %231 = dma.vmem_to_hbm [thread:$0]  %s229_s17, 32, %s449_s4, [#allocation6]  }
 0x2cf   :  { %353 = dma.done.wait [#allocation6], 32  }
 0x2d0   :  { %354 = vsyncadd [#allocation6], 4294967264 }
 0x2d1   :  { %235 = vsyncpa [#allocation5], 1 }
 0x2d2   :  { %236 = vsyncpa [#allocation8], 1 }
 0x2d3   :  { %237 = vsyncpa [#allocation6], 1 }

</bundles_post_ra>
